<compile_context>
chip_gen: v7x
topology: tpu7x:2x2x1
jax: 0.10.0
libtpu: 0.0.40
codegen_flags: <defaults>
</compile_context>

<pallas_src>
import jax
import jax.numpy as jnp
from jax import lax
from jax.experimental import pallas as pl
from jax.experimental.pallas import tpu as pltpu


def critic_mlp_kernel(obs_ref, acts_ref, w1o_ref, w1a_ref, b1_ref,
                      w2_ref, b2_ref, wo_ref, bo_ref, out_ref):
    """One batch tile of the critic MLP. All weights fully resident in VMEM."""
    # Layer 1: concat(obs, acts) @ W1 == obs @ W1_obs + acts @ W1_acts
    h1 = jnp.tanh(
        jnp.dot(obs_ref[...], w1o_ref[...], preferred_element_type=jnp.float32)
        + jnp.dot(acts_ref[...], w1a_ref[...], preferred_element_type=jnp.float32)
        + b1_ref[...])                                          # (TB, H)
    h2 = jnp.tanh(
        jnp.dot(h1, w2_ref[...], preferred_element_type=jnp.float32)
        + b2_ref[...])                                          # (TB, H)
    # Final projection as (1,H) . (TB,H)^T -> (1,TB): result is produced
    # directly in the lane-dense output layout (no (TB,1) column + relayout).
    q = lax.dot_general(wo_ref[...], h2,
                        dimension_numbers=(((1,), (1,)), ((), ())),
                        preferred_element_type=jnp.float32)     # (1, TB)
    out_ref[...] = q + bo_ref[0, 0]                             # scalar from SMEM


# ----------------------------- tiling helpers --------------------------------

_TILE_CAP = 8192          # review-suggested upper bound on the batch tile
_SPLIT_THRESHOLD = 2048   # >= this many (padded) rows -> use 2 tiles for v7x


def _round_up(x, m):
    return ((x + m - 1) // m) * m


def _lane(d):   # last-dim VMEM footprint (128-lane padding)
    return _round_up(max(int(d), 1), 128)


def _sub(d):    # second-to-last-dim VMEM footprint (8-sublane padding)
    return _round_up(max(int(d), 1), 8)


def _weight_vmem_bytes(ob_dim, ac_dim, h, buffers):
    f32 = 4
    per_copy = (_sub(ob_dim) * _lane(h)      # W1_obs
                + _sub(ac_dim) * _lane(h)    # W1_acts
                + _sub(1) * _lane(h)         # b1
                + _sub(h) * _lane(h)         # W2
                + _sub(1) * _lane(h)         # b2
                + _sub(1) * _lane(h)) * f32  # W_out row
    return buffers * per_copy


def _per_row_vmem_bytes(ob_dim, ac_dim, h):
    """VMEM bytes per batch row, including lane padding of skinny blocks."""
    f32 = 4
    inputs = 2 * (_lane(ob_dim) + _lane(ac_dim)) * f32   # obs+acts, double-buffered
    out = 2 * 8 * f32                                     # (1, tile) -> 8 sublanes, x2
    tmp = 3 * _lane(h) * f32                              # h1, h2 + headroom for temps
    return inputs + out + tmp


# ----------------------------- forward wrapper -------------------------------

@jax.jit
def critic_forward(obs, acts, params):
    """Pallas implementation of BootstrappedContinuousCritic.forward -> (N,)."""
    obs = obs.astype(jnp.float32)
    acts = acts.astype(jnp.float32)
    n, ob_dim = obs.shape
    ac_dim = acts.shape[1]

    w1, b1, w2, b2, wo, bo = params
    h = w1.shape[1]
    w1 = w1.astype(jnp.float32)
    w2 = w2.astype(jnp.float32)
    b1 = b1.reshape(1, h).astype(jnp.float32)       # accept (H,) or (1,H) biases
    b2 = b2.reshape(1, h).astype(jnp.float32)
    wo_row = wo.reshape(1, h).astype(jnp.float32)   # final layer as a row vector
    bo_s = bo.reshape(1, 1).astype(jnp.float32)     # scalar output bias -> SMEM

    # Split W1 so the obs/acts concat never materializes in HBM (free slice).
    w1o = w1[:ob_dim]            # (ob_dim, H)
    w1a = w1[ob_dim:]            # (ac_dim, H)

    if n == 0:
        return jnp.zeros((0,), jnp.float32)

    # ---- explicit VMEM budgeting (per-generation) ---------------------------
    try:
        vmem_cap = int(pltpu.get_tpu_info().vmem_capacity_bytes)
    except Exception:                      # pragma: no cover - conservative default
        vmem_cap = 64 << 20                # v7x physical size
    vmem_limit = min(vmem_cap * 3 // 4, 96 << 20)

    # Single-buffer the grid-invariant weights only when W2 is big enough for
    # the saving to matter; tiny weights keep the default double-buffering.
    single_buffer_weights = h >= 512

    fixed = _weight_vmem_bytes(ob_dim, ac_dim, h,
                               1 if single_buffer_weights else 2) + (1 << 20)
    per_row = _per_row_vmem_bytes(ob_dim, ac_dim, h)
    budget = int(vmem_limit * 0.85)
    max_tile = max(128, min(_TILE_CAP,
                            ((budget - fixed) // per_row) // 128 * 128))

    # ---- tile / grid selection (no jnp.pad copy of the inputs) --------------
    n128 = _round_up(n, 128)
    if n128 <= max_tile:
        num_tiles = 2 if n128 >= _SPLIT_THRESHOLD else 1   # 2 tiles -> both v7x TCs
    else:
        num_tiles = -(-n128 // max_tile)
        if num_tiles % 2:
            num_tiles += 1                                  # keep v7x cores balanced
    tile_b = _round_up(-(-n128 // num_tiles), 128)
    grid = (pl.cdiv(n, tile_b),)

    def wspec(shape):
        if single_buffer_weights:
            return pl.BlockSpec(shape, lambda i: (0, 0),
                                pipeline_mode=pl.Buffered(1))
        return pl.BlockSpec(shape, lambda i: (0, 0))

    q = pl.pallas_call(
        critic_mlp_kernel,
        out_shape=jax.ShapeDtypeStruct((1, n), jnp.float32),
        grid_spec=pltpu.PrefetchScalarGridSpec(
            num_scalar_prefetch=0,
            grid=grid,
            in_specs=[
                pl.BlockSpec((tile_b, ob_dim), lambda i: (i, 0)),   # obs tile
                pl.BlockSpec((tile_b, ac_dim), lambda i: (i, 0)),   # acts tile
                wspec((ob_dim, h)),                                 # W1_obs
                wspec((ac_dim, h)),                                 # W1_acts
                wspec((1, h)),                                      # b1
                wspec((h, h)),                                      # W2
                wspec((1, h)),                                      # b2
                wspec((1, h)),                                      # W_out row
                pl.BlockSpec(memory_space=pltpu.MemorySpace.SMEM),  # b_out scalar
            ],
            out_specs=pl.BlockSpec((1, tile_b), lambda i: (0, i)),  # lane-dense row
        ),
        compiler_params=pltpu.CompilerParams(
            dimension_semantics=("parallel",),
            vmem_limit_bytes=int(vmem_limit)),
    )(obs, acts, w1o, w1a, b1, w2, b2, wo_row, bo_s)

    # Lane-dense (1, N) row -> (N,)  (matches torch's .squeeze(1)).
    return q[0]


# ----------------------------- reference / init ------------------------------

def init_critic_params(key, in_dim, hidden, out_dim=1):
    """Deterministic parameter init (shapes match build_mlp(in, 1, 2, hidden))."""
    k1, k2, k3 = jax.random.split(key, 3)

    def linear(k, fan_in, fan_out):
        kw, kb = jax.random.split(k)
        scale = 1.0 / jnp.sqrt(jnp.float32(fan_in))
        w = jax.random.uniform(kw, (fan_in, fan_out), jnp.float32, -scale, scale)
        b = jax.random.uniform(kb, (1, fan_out), jnp.float32, -scale, scale)
        return w, b

    w1, b1 = linear(k1, in_dim, hidden)
    w2, b2 = linear(k2, hidden, hidden)
    wo, bo = linear(k3, hidden, out_dim)
    return (w1, b1, w2, b2, wo, bo)


def critic_forward_ref(obs, acts, params):
    """Pure-JAX reference for correctness checking."""
    w1, b1, w2, b2, wo, bo = params
    x = jnp.concatenate([obs, acts], axis=-1)
    h1 = jnp.tanh(x @ w1 + b1.reshape(1, -1))
    h2 = jnp.tanh(h1 @ w2 + b2.reshape(1, -1))
    return (h2 @ wo.reshape(-1, 1) + bo.reshape(1, 1))[:, 0]


if __name__ == "__main__":
    # Small, forward-consistent shapes: ob_dim=8, ac_dim=4, hidden=32.
    ob_dim, ac_dim, hidden = 8, 4, 32
    key = jax.random.PRNGKey(0)
    k_par, k_data = jax.random.split(key)
    params = init_critic_params(k_par, ob_dim + ac_dim, hidden)

    # Check 1: tiny batch (ragged single tile, grid=1).
    # Check 2: larger ragged batch that triggers the 2-tile "parallel" split.
    for batch in (8, 2500):
        k_data, k_obs, k_act = jax.random.split(k_data, 3)
        obs = jax.random.normal(k_obs, (batch, ob_dim), dtype=jnp.float32)
        acts = jax.random.normal(k_act, (batch, ac_dim), dtype=jnp.float32)

        q = jax.block_until_ready(critic_forward(obs, acts, params))
        q_ref = critic_forward_ref(obs, acts, params)
        assert q.shape == (batch,), q.shape
        assert jnp.allclose(q, q_ref, atol=1e-4, rtol=1e-4), (batch, q, q_ref)

    # TODO(synk): training-side methods (SmoothL1 loss, Adam update, target-EMA,
    # compute_target_value with actor sampling) are out of scope for the forward kernel.
    print("KERNEL_OK")
</pallas_src>

<mosaic_0001>
module attributes {stable_mosaic.version = 11 : i64} {
  func.func @critic_mlp_kernel(%arg0: i32, %arg1: memref<128x8xf32, #tpu.memory_space<vmem>>, %arg2: memref<128x4xf32, #tpu.memory_space<vmem>>, %arg3: memref<8x32xf32, #tpu.memory_space<vmem>>, %arg4: memref<4x32xf32, #tpu.memory_space<vmem>>, %arg5: memref<1x32xf32, #tpu.memory_space<vmem>>, %arg6: memref<32x32xf32, #tpu.memory_space<vmem>>, %arg7: memref<1x32xf32, #tpu.memory_space<vmem>>, %arg8: memref<1x32xf32, #tpu.memory_space<vmem>>, %arg9: memref<1x1xf32, #tpu.memory_space<smem>>, %arg10: memref<1x128xf32, #tpu.memory_space<vmem>>) attributes {dimension_semantics = [#tpu.dimension_semantics<parallel>], iteration_bounds = array<i64: 1>, scalar_prefetch = 0 : i64, scratch_operands = 0 : i64, tpu.core_type = #tpu.core_type<tc>, window_params = [{transform_indices = @transform_0, window_bounds = array<i64: 128, 8>}, {transform_indices = @transform_1, window_bounds = array<i64: 128, 4>}, {pipeline_mode = #tpu.pipeline_mode<synchronous>, transform_indices = @transform_2, window_bounds = array<i64: 8, 32>}, {pipeline_mode = #tpu.pipeline_mode<synchronous>, transform_indices = @transform_3, window_bounds = array<i64: 4, 32>}, {pipeline_mode = #tpu.pipeline_mode<synchronous>, transform_indices = @transform_4, window_bounds = array<i64: 1, 32>}, {pipeline_mode = #tpu.pipeline_mode<synchronous>, transform_indices = @transform_5, window_bounds = array<i64: 32, 32>}, {pipeline_mode = #tpu.pipeline_mode<synchronous>, transform_indices = @transform_6, window_bounds = array<i64: 1, 32>}, {pipeline_mode = #tpu.pipeline_mode<synchronous>, transform_indices = @transform_7, window_bounds = array<i64: 1, 32>}, {transform_indices = @transform_8, window_bounds = array<i64: 1, 1>}, {transform_indices = @transform_9, window_bounds = array<i64: 1, 128>}]} {
    %c0 = arith.constant 0 : index
    %c0_0 = arith.constant 0 : index
    %0 = vector.load %arg1[%c0, %c0_0] : memref<128x8xf32, #tpu.memory_space<vmem>>, vector<128x8xf32>
    %c0_1 = arith.constant 0 : index
    %c0_2 = arith.constant 0 : index
    %1 = vector.load %arg3[%c0_1, %c0_2] : memref<8x32xf32, #tpu.memory_space<vmem>>, vector<8x32xf32>
    %cst = arith.constant dense<0.000000e+00> : vector<128x32xf32>
    %2 = tpu.matmul %0, %1, %cst {dimension_numbers = #tpu.dot_dimension_numbers<[1], [0], [0], [1], [0, 0, 1, 1], [], []>} : vector<128x8xf32>, vector<8x32xf32>, vector<128x32xf32> -> vector<128x32xf32>
    %c0_3 = arith.constant 0 : index
    %c0_4 = arith.constant 0 : index
    %3 = vector.load %arg2[%c0_3, %c0_4] : memref<128x4xf32, #tpu.memory_space<vmem>>, vector<128x4xf32>
    %c0_5 = arith.constant 0 : index
    %c0_6 = arith.constant 0 : index
    %4 = vector.load %arg4[%c0_5, %c0_6] : memref<4x32xf32, #tpu.memory_space<vmem>>, vector<4x32xf32>
    %cst_7 = arith.constant dense<0.000000e+00> : vector<128x32xf32>
    %5 = tpu.matmul %3, %4, %cst_7 {dimension_numbers = #tpu.dot_dimension_numbers<[1], [0], [0], [1], [0, 0, 1, 1], [], []>} : vector<128x4xf32>, vector<4x32xf32>, vector<128x32xf32> -> vector<128x32xf32>
    %6 = arith.addf %2, %5 : vector<128x32xf32>
    %c0_8 = arith.constant 0 : index
    %c0_9 = arith.constant 0 : index
    %7 = vector.load %arg5[%c0_8, %c0_9] : memref<1x32xf32, #tpu.memory_space<vmem>>, vector<1x32xf32>
    %8 = vector.broadcast %7 : vector<1x32xf32> to vector<128x32xf32>
    %9 = arith.addf %6, %8 : vector<128x32xf32>
    %10 = math.tanh %9 : vector<128x32xf32>
    %c0_10 = arith.constant 0 : index
    %c0_11 = arith.constant 0 : index
    %11 = vector.load %arg6[%c0_10, %c0_11] : memref<32x32xf32, #tpu.memory_space<vmem>>, vector<32x32xf32>
    %cst_12 = arith.constant dense<0.000000e+00> : vector<128x32xf32>
    %12 = tpu.matmul %10, %11, %cst_12 {dimension_numbers = #tpu.dot_dimension_numbers<[1], [0], [0], [1], [0, 0, 1, 1], [], []>} : vector<128x32xf32>, vector<32x32xf32>, vector<128x32xf32> -> vector<128x32xf32>
    %c0_13 = arith.constant 0 : index
    %c0_14 = arith.constant 0 : index
    %13 = vector.load %arg7[%c0_13, %c0_14] : memref<1x32xf32, #tpu.memory_space<vmem>>, vector<1x32xf32>
    %14 = vector.broadcast %13 : vector<1x32xf32> to vector<128x32xf32>
    %15 = arith.addf %12, %14 : vector<128x32xf32>
    %16 = math.tanh %15 : vector<128x32xf32>
    %c0_15 = arith.constant 0 : index
    %c0_16 = arith.constant 0 : index
    %17 = vector.load %arg8[%c0_15, %c0_16] : memref<1x32xf32, #tpu.memory_space<vmem>>, vector<1x32xf32>
    %cst_17 = arith.constant dense<0.000000e+00> : vector<1x128xf32>
    %18 = tpu.matmul %17, %16, %cst_17 {dimension_numbers = #tpu.dot_dimension_numbers<[1], [1], [0], [0], [0, 0, 1, 0], [], []>} : vector<1x32xf32>, vector<128x32xf32>, vector<1x128xf32> -> vector<1x128xf32>
    %c0_18 = arith.constant 0 : index
    %c0_19 = arith.constant 0 : index
    %19 = memref.load %arg9[%c0_18, %c0_19] : memref<1x1xf32, #tpu.memory_space<smem>>
    %20 = vector.broadcast %19 : f32 to vector<1x128xf32>
    %21 = arith.addf %18, %20 : vector<1x128xf32>
    %c0_20 = arith.constant 0 : index
    %c0_21 = arith.constant 0 : index
    %22 = vector.load %arg10[%c0_20, %c0_21] : memref<1x128xf32, #tpu.memory_space<vmem>>, vector<1x128xf32>
    tpu.vector_store %arg10[%c0_20, %c0_21], %21 {strides = array<i32>} : memref<1x128xf32, #tpu.memory_space<vmem>>, vector<1x128xf32>,
    return
  }
  func.func @transform_0(%arg0: i32) -> (i32, i32) {
    %c0_i32 = arith.constant 0 : i32
    %c0_i32_0 = arith.constant 0 : i32
    return %arg0, %c0_i32 : i32, i32
  }
  func.func @transform_1(%arg0: i32) -> (i32, i32) {
    %c0_i32 = arith.constant 0 : i32
    %c0_i32_0 = arith.constant 0 : i32
    return %arg0, %c0_i32 : i32, i32
  }
  func.func @transform_2(%arg0: i32) -> (i32, i32) {
    %c0_i32 = arith.constant 0 : i32
    %c0_i32_0 = arith.constant 0 : i32
    %c0_i32_1 = arith.constant 0 : i32
    return %c0_i32, %c0_i32_0 : i32, i32
  }
  func.func @transform_3(%arg0: i32) -> (i32, i32) {
    %c0_i32 = arith.constant 0 : i32
    %c0_i32_0 = arith.constant 0 : i32
    %c0_i32_1 = arith.constant 0 : i32
    return %c0_i32, %c0_i32_0 : i32, i32
  }
  func.func @transform_4(%arg0: i32) -> (i32, i32) {
    %c0_i32 = arith.constant 0 : i32
    %c0_i32_0 = arith.constant 0 : i32
    %c0_i32_1 = arith.constant 0 : i32
    return %c0_i32, %c0_i32_0 : i32, i32
  }
  func.func @transform_5(%arg0: i32) -> (i32, i32) {
    %c0_i32 = arith.constant 0 : i32
    %c0_i32_0 = arith.constant 0 : i32
    %c0_i32_1 = arith.constant 0 : i32
    return %c0_i32, %c0_i32_0 : i32, i32
  }
  func.func @transform_6(%arg0: i32) -> (i32, i32) {
    %c0_i32 = arith.constant 0 : i32
    %c0_i32_0 = arith.constant 0 : i32
    %c0_i32_1 = arith.constant 0 : i32
    return %c0_i32, %c0_i32_0 : i32, i32
  }
  func.func @transform_7(%arg0: i32) -> (i32, i32) {
    %c0_i32 = arith.constant 0 : i32
    %c0_i32_0 = arith.constant 0 : i32
    %c0_i32_1 = arith.constant 0 : i32
    return %c0_i32, %c0_i32_0 : i32, i32
  }
  func.func @transform_8(%arg0: i32) -> (i32, i32) {
    %c0_i32 = arith.constant 0 : i32
    %c0_i32_0 = arith.constant 0 : i32
    %c0_i32_1 = arith.constant 0 : i32
    return %c0_i32, %c0_i32_0 : i32, i32
  }
  func.func @transform_9(%arg0: i32) -> (i32, i32) {
    %c0_i32 = arith.constant 0 : i32
    %c0_i32_0 = arith.constant 0 : i32
    return %c0_i32, %arg0 : i32, i32
  }
}

</mosaic_0001>

<bundles_post_ra>
// kernel: critic_forward.1
= control target key start
LH: loop header
LB: loop body
LE: loop exit
PB: predicated region body
PF: predicated region fallthrough
CT: control target
= control target key end

     0   :  { %vm117_vm0 = vcmask 1043456   ;;  %vm68_vm1 = vcmask 31744   ;;  %s1572_s0 = inlined_call_operand.vmem [shape: f32[8,8], index: 0, kind: input, shape index: {}]   ;;  %s1573_s1 = inlined_call_operand.vmem [shape: f32[8,4], index: 1, kind: input, shape index: {}]   ;;  %s1574_s2 = inlined_call_operand.vmem [shape: f32[8,32], index: 2, kind: input, shape index: {}]   ;;  %s1575_s3 = inlined_call_operand.vmem [shape: f32[4,32], index: 3, kind: input, shape index: {}]   ;;  %s1576_s4 = inlined_call_operand.vmem [shape: f32[1,32], index: 4, kind: input, shape index: {}]   ;;  %s1577_s5 = inlined_call_operand.vmem [shape: f32[32,32], index: 5, kind: input, shape index: {}]   ;;  %s1578_s6 = inlined_call_operand.vmem [shape: f32[1,32], index: 6, kind: input, shape index: {}]   ;;  %s1579_s7 = inlined_call_operand.vmem [shape: f32[1,32], index: 7, kind: input, shape index: {}]   ;;  %s1580_s8 = inlined_call_operand.<no memory space> [shape: f32[1,1], index: 8, kind: input, shape index: {}]   ;;  %s1581_s9 = inlined_call_operand.hbm [shape: f32[1,8], index: 9, kind: output, shape index: {}]  }
   0x1   :  { %v67_v0 = vld [vmem:[%s1575_s3] sm:$0xf]  ;;  %v52_v2 = vld [vmem:[%s1573_s1 + $0x8] sm:$0xff]  ;;  %v53_v4 = vld [vmem:[%s1573_s1 + $0x10] sm:$0xff] }
   0x2   :  { %v51_v1 = vld [vmem:[%s1573_s1] sm:$0xff]  ;;  %998 = vmatprep.subr.msk.mxu0 %vm117_vm0, %v67_v0  ;;  %v54_v5 = vld [vmem:[%s1573_s1 + $0x18] sm:$0xff]  ;;  %v56_v7 = vld [vmem:[%s1573_s1 + $0x28] sm:$0xff] }
   0x3   :  { %1000 = vmatprep.mubr.msk.f32.mxu0 %vm68_vm1, %v51_v1  ;;  %v50_v3 = vld [vmem:[%s1574_s2] sm:$0xff]  ;;  %999 = vmatpush3.msk.msra.mxu0 %vm117_vm0, %v67_v0  ;;  %v57_v8 = vld [vmem:[%s1573_s1 + $0x30] sm:$0xff] }
   0x4   :  { %1001 = vmatmul.mubr.msk.f32.vlgmr.msra.gmra.mrb[0].mxu0 %vm68_vm1, %v52_v2  ;;  %1024 = vmatprep.subr.mxu0 %v50_v3  ;;  %v55_v6 = vld [vmem:[%s1573_s1 + $0x20] sm:$0xff] }
   0x5   :  { %1025 = vmatpush3.msra.mxu0 %v50_v3  ;;  %1003 = vmatprep.mubr.msk.f32.mxu0 %vm68_vm1, %v53_v4 }
   0x8   :  { %1004 = vmatmul.mubr.msk.f32.gmra.mrb[2].mxu0 %vm68_vm1, %v54_v5 }
   0x9   :  { %1006 = vmatprep.mubr.msk.f32.mxu0 %vm68_vm1, %v55_v6 }
   0xc   :  { %1007 = vmatmul.mubr.msk.f32.gmra.mrb[4].mxu0 %vm68_vm1, %v56_v7 }
   0xd   :  { %15 = vsyncpa [#allocation4], 0  ;;  %1009 = vmatprep.mubr.msk.f32.mxu0 %vm68_vm1, %v57_v8  ;;  %v58_v9 = vld [vmem:[%s1573_s1 + $0x38] sm:$0xff]  ;;  %v59_v10 = vld [vmem:[%s1573_s1 + $0x40] sm:$0xff]  ;;  %vm266_vm2 = vcmask 64512   ;;  %vm510_vm3 = vcmask 261120  }
   0xe   :  { %v60_v11 = vld [vmem:[%s1573_s1 + $0x48] sm:$0xff]  ;;  %v61_v12 = vld [vmem:[%s1573_s1 + $0x50] sm:$0xff]  ;;  %v62_v13 = vld [vmem:[%s1573_s1 + $0x58] sm:$0xff]  ;;  %vm1266_vm4 = vmmov 0   ;;  %s1268_s18 = smov [#allocation3]  }
   0xf   :  { %v63_v14 = vld [vmem:[%s1573_s1 + $0x60] sm:$0xff]  ;;  %v64_v15 = vld [vmem:[%s1573_s1 + $0x68] sm:$0xff]  ;;  %v65_v16 = vld [vmem:[%s1573_s1 + $0x70] sm:$0xff]  ;;  %s851_s3 = sshll.u32 %s1268_s18, 4  ;;  %s852_s3 = int_to_ptr.vmem [resolvable:$true] %s851_s3 }
  0x10   :  { %1010 = vmatmul.mubr.msk.f32.gmra.mrb[6].mxu0 %vm68_vm1, %v58_v9  ;;  %v66_v17 = vld [vmem:[%s1573_s1 + $0x78] sm:$0xff]  ;;  %v34_v18 = vld [vmem:[%s1572_s0] sm:$0xff]  ;;  %v35_v19 = vld [vmem:[%s1572_s0 + $0x8] sm:$0xff]  ;;  %s1241_s19 = scalar_lea.vmem %s852_s3, 16  ;;  %s1245_s20 = scalar_lea.vmem %s852_s3, 32 }
  0x11   :  { %1012 = vmatprep.mubr.msk.f32.mxu0 %vm68_vm1, %v59_v10  ;;  %v36_v20 = vld [vmem:[%s1572_s0 + $0x10] sm:$0xff]  ;;  %v37_v21 = vld [vmem:[%s1572_s0 + $0x18] sm:$0xff]  ;;  %v38_v22 = vld [vmem:[%s1572_s0 + $0x20] sm:$0xff]  ;;  %p1242_p0 = scmp.ne.s32.totalorder %s852_s3, %s1241_s19  ;;  %p1246_p1 = scmp.lt.s32.totalorder %s852_s3, %s852_s3 }
  0x12   :  { %v39_v23 = vld [vmem:[%s1572_s0 + $0x28] sm:$0xff]  ;;  %v40_v24 = vld [vmem:[%s1572_s0 + $0x30] sm:$0xff]  ;;  %v41_v25 = vld [vmem:[%s1572_s0 + $0x38] sm:$0xff]  ;;  %p1247_p2 = scmp.lt.s32.totalorder %s1245_s20, %s1241_s19 }
  0x13   :  { %v42_v26 = vld [vmem:[%s1572_s0 + $0x40] sm:$0xff]  ;;  %v43_v27 = vld [vmem:[%s1572_s0 + $0x48] sm:$0xff]  ;;  %v44_v28 = vld [vmem:[%s1572_s0 + $0x50] sm:$0xff] }
  0x14   :  { %1013 = vmatmul.mubr.msk.f32.gmra.mrb[8].mxu0 %vm68_vm1, %v60_v11  ;;  %v45_v29 = vld [vmem:[%s1572_s0 + $0x58] sm:$0xff]  ;;  %v46_v30 = vld [vmem:[%s1572_s0 + $0x60] sm:$0xff]  ;;  %v47_v31 = vld [vmem:[%s1572_s0 + $0x68] sm:$0xff]  ;;  %p1248_p3 = por %p1247_p2, %p1246_p1 }
  0x15   :  { %1015 = vmatprep.mubr.msk.f32.mxu0 %vm68_vm1, %v61_v12  ;;  %v48_v32 = vld [vmem:[%s1572_s0 + $0x70] sm:$0xff]  ;;  %v49_v33 = vld [vmem:[%s1572_s0 + $0x78] sm:$0xff]  ;;  %v499_v34 = vld [vmem:[%s1577_s5] sm:$0xff] }
  0x16   :  { %v500_v35 = vld [vmem:[%s1577_s5 + $0x8] sm:$0xff]  ;;  %v501_v37 = vld [vmem:[%s1577_s5 + $0x10] sm:$0xff]  ;;  %v502_v38 = vld [vmem:[%s1577_s5 + $0x18] sm:$0xff]  ;;  %p1249_p4 = pnand %p1248_p3, %p1242_p0 }
  0x17   :  { %v1117_v36 = vpack.c.bf16 %v500_v35, %v499_v34  ;;  %v1121_v39 = vpack.c.bf16 %v502_v38, %v501_v37  ;;  %v1468_v40 = vld [vmem:[%s1576_s4] ss:$0 sm:$0xff]  ;;  %vm1518_vm5 = vmpackc.low %vm510_vm3, %vm510_vm3 }
  0x18   :  { %1016 = vmatmul.mubr.msk.f32.gmra.mrb[10].mxu0 %vm68_vm1, %v62_v13 }
  0x19   :  { %1018 = vmatprep.mubr.msk.f32.mxu0 %vm68_vm1, %v63_v14  ;;  %1118 = vmatprep.subr.bf16.mxu1 %v1117_v36 }
  0x1a   :  { %1120 = vmatpush3.bf16.msra.mxu1 %v1117_v36 }
  0x1b   :  { %1122 = vmatprep.subr.bf16.mxu1 %v1121_v39 }
  0x1c   :  { %1019 = vmatmul.mubr.msk.f32.gmra.mrb[12].mxu0 %vm68_vm1, %v64_v15 }
  0x1d   :  { %1021 = vmatprep.mubr.msk.f32.mxu0 %vm68_vm1, %v65_v16 }
  0x1e   :  { %1124 = vmatpush3.bf16.msra.mxu1 %v1121_v39 }
  0x20   :  { %1022 = vmatmul.mubr.msk.f32.gmra.mrb[14].mxu0 %vm68_vm1, %v66_v17 }
  0x21   :  { %1026 = vmatprep.mubr.msk.f32.mxu0 %vm266_vm2, %v34_v18 }
  0x24   :  { %1027 = vmatmul.mubr.msk.f32.vlgmr.msra.gmra.mrb[0].mxu0 %vm266_vm2, %v35_v19 }
  0x25   :  { %1029 = vmatprep.mubr.msk.f32.mxu0 %vm266_vm2, %v36_v20 }
  0x28   :  { %1030 = vmatmul.mubr.msk.f32.gmra.mrb[2].mxu0 %vm266_vm2, %v37_v21 }
  0x29   :  { %1032 = vmatprep.mubr.msk.f32.mxu0 %vm266_vm2, %v38_v22 }
  0x2c   :  { %1033 = vmatmul.mubr.msk.f32.gmra.mrb[4].mxu0 %vm266_vm2, %v39_v23 }
  0x2d   :  { %1035 = vmatprep.mubr.msk.f32.mxu0 %vm266_vm2, %v40_v24 }
  0x30   :  { %1036 = vmatmul.mubr.msk.f32.gmra.mrb[6].mxu0 %vm266_vm2, %v41_v25  ;;  %v1265_v25 = vmov 0.0|0.0  }
  0x31   :  { %1038 = vmatprep.mubr.msk.f32.mxu0 %vm266_vm2, %v42_v26  ;;  %1125 = vmatprep.subr.bf16.mxu1 %v1265_v25  ;;  %v1267_v26 = vmov 0.0  }
  0x34   :  { %1039 = vmatmul.mubr.msk.f32.gmra.mrb[8].mxu0 %vm266_vm2, %v43_v27  ;;  %v1506_v27 = vld [vmem:[%s1578_s6] ss:$0 sm:$0xff] }
  0x35   :  { %1041 = vmatprep.mubr.msk.f32.mxu0 %vm266_vm2, %v44_v28 }
  0x38   :  { %1042 = vmatmul.mubr.msk.f32.gmra.mrb[10].mxu0 %vm266_vm2, %v45_v29 }
  0x39   :  { %1044 = vmatprep.mubr.msk.f32.mxu0 %vm266_vm2, %v46_v30 }
  0x3c   :  { %1045 = vmatmul.mubr.msk.f32.gmra.mrb[12].mxu0 %vm266_vm2, %v47_v31 }
  0x3d   :  { %1047 = vmatprep.mubr.msk.f32.mxu0 %vm266_vm2, %v48_v32 }
  0x40   :  { %1048 = vmatmul.mubr.msk.f32.gmra.mrb[14].mxu0 %vm266_vm2, %v49_v33 }
  0xf7   :  { %v1028_v41 = vpop.f32.mrb[0].mxu0 }
  0xf8   :  { %v468_v42 = vadd.f32 %v1028_v41, %v1468_v40  ;;  %v381_v43 = vpop.f32.mrb[1].mxu0 }
  0xf9   :  { %v467_v44 = vadd.f32 %v1468_v40, %v381_v43 }
  0xfb   :  { %1177 = vtanh.f32 %v467_v44  ;;  %v1031_v45 = vpop.f32.mrb[2].mxu0 }
  0xfc   :  { %1179 = vtanh.f32 %v468_v42  ;;  %v470_v46 = vadd.f32 %v1031_v45, %v1468_v40  ;;  %v391_v47 = vpop.f32.mrb[3].mxu0 }
  0xfd   :  { %v469_v48 = vadd.f32 %v1468_v40, %v391_v47 }
  0xff   :  { %1181 = vtanh.f32 %v469_v48  ;;  %v1034_v49 = vpop.f32.mrb[4].mxu0 }
 0x100   :  { %1183 = vtanh.f32 %v470_v46  ;;  %v472_v50 = vadd.f32 %v1034_v49, %v1468_v40  ;;  %v401_v51 = vpop.f32.mrb[5].mxu0 }
 0x101   :  { %v471_v52 = vadd.f32 %v1468_v40, %v401_v51 }
 0x103   :  { %1185 = vtanh.f32 %v471_v52  ;;  %v1037_v53 = vpop.f32.mrb[6].mxu0 }
 0x104   :  { %1187 = vtanh.f32 %v472_v50  ;;  %v474_v54 = vadd.f32 %v1037_v53, %v1468_v40  ;;  %v411_v55 = vpop.f32.mrb[7].mxu0 }
 0x105   :  { %v1178_v56 = vpop.eup %1177  ;;  %v473_v57 = vadd.f32 %v1468_v40, %v411_v55 }
 0x106   :  { %v1180_v58 = vpop.eup %1179  ;;  %1058 = vmatprep.mubr.msk.f32.mxu1 %vm510_vm3, %v1178_v56 }
 0x107   :  { %1189 = vtanh.f32 %v473_v57  ;;  %v1040_v59 = vpop.f32.mrb[8].mxu0  ;;  %1059 = vmatmul.mubr.msk.f32.vlgmr.msra.gmra.mrb[0].mxu1 %vm510_vm3, %v1180_v58 }
 0x108   :  { %1191 = vtanh.f32 %v474_v54  ;;  %v476_v60 = vadd.f32 %v1040_v59, %v1468_v40  ;;  %v421_v61 = vpop.f32.mrb[9].mxu0 }
 0x109   :  { %v1182_v62 = vpop.eup %1181  ;;  %v475_v63 = vadd.f32 %v1468_v40, %v421_v61 }
 0x10a   :  { %v1184_v0 = vpop.eup %1183  ;;  %1061 = vmatprep.mubr.msk.f32.mxu1 %vm510_vm3, %v1182_v62 }
 0x10b   :  { %1193 = vtanh.f32 %v475_v63  ;;  %v1043_v1 = vpop.f32.mrb[10].mxu0  ;;  %1062 = vmatmul.mubr.msk.f32.gmra.mrb[2].mxu1 %vm510_vm3, %v1184_v0 }
 0x10c   :  { %1195 = vtanh.f32 %v476_v60  ;;  %v478_v2 = vadd.f32 %v1043_v1, %v1468_v40  ;;  %v431_v3 = vpop.f32.mrb[11].mxu0 }
 0x10d   :  { %v1186_v4 = vpop.eup %1185  ;;  %v477_v5 = vadd.f32 %v1468_v40, %v431_v3 }
 0x10e   :  { %v1188_v6 = vpop.eup %1187  ;;  %1064 = vmatprep.mubr.msk.f32.mxu1 %vm510_vm3, %v1186_v4 }
 0x10f   :  { %1197 = vtanh.f32 %v477_v5  ;;  %v1046_v7 = vpop.f32.mrb[12].mxu0  ;;  %1065 = vmatmul.mubr.msk.f32.gmra.mrb[4].mxu1 %vm510_vm3, %v1188_v6 }
 0x110   :  { %1199 = vtanh.f32 %v478_v2  ;;  %v480_v8 = vadd.f32 %v1046_v7, %v1468_v40  ;;  %v441_v9 = vpop.f32.mrb[13].mxu0 }
 0x111   :  { %v1190_v10 = vpop.eup %1189  ;;  %v479_v11 = vadd.f32 %v1468_v40, %v441_v9 }
 0x112   :  { %v1192_v12 = vpop.eup %1191  ;;  %1067 = vmatprep.mubr.msk.f32.mxu1 %vm510_vm3, %v1190_v10 }
 0x113   :  { %1201 = vtanh.f32 %v479_v11  ;;  %v1049_v13 = vpop.f32.mrb[14].mxu0  ;;  %1068 = vmatmul.mubr.msk.f32.gmra.mrb[6].mxu1 %vm510_vm3, %v1192_v12 }
 0x114   :  { %1203 = vtanh.f32 %v480_v8  ;;  %v482_v14 = vadd.f32 %v1049_v13, %v1468_v40  ;;  %v451_v15 = vpop.f32.mrb[15].mxu0 }
 0x115   :  { %v1194_v16 = vpop.eup %1193  ;;  %v481_v17 = vadd.f32 %v1468_v40, %v451_v15 }
 0x116   :  { %v1196_v18 = vpop.eup %1195  ;;  %1070 = vmatprep.mubr.msk.f32.mxu1 %vm510_vm3, %v1194_v16 }
 0x117   :  { %1205 = vtanh.f32 %v481_v17  ;;  %1071 = vmatmul.mubr.msk.f32.gmra.mrb[8].mxu1 %vm510_vm3, %v1196_v18 }
 0x118   :  { %1207 = vtanh.f32 %v482_v14 }
 0x119   :  { %v1198_v19 = vpop.eup %1197 }
 0x11a   :  { %v1200_v20 = vpop.eup %1199  ;;  %1073 = vmatprep.mubr.msk.f32.mxu1 %vm510_vm3, %v1198_v19 }
 0x11b   :  { %1074 = vmatmul.mubr.msk.f32.gmra.mrb[10].mxu1 %vm510_vm3, %v1200_v20 }
 0x11d   :  { %v1202_v21 = vpop.eup %1201 }
 0x11e   :  { %v1204_v22 = vpop.eup %1203  ;;  %1076 = vmatprep.mubr.msk.f32.mxu1 %vm510_vm3, %v1202_v21  ;;  %v720_v21 = vld [vmem:[%s1579_s7] sm:$0x1] }
 0x11f   :  { %1077 = vmatmul.mubr.msk.f32.gmra.mrb[12].mxu1 %vm510_vm3, %v1204_v22  ;;  %v722_v22 = vstv %s1580_s8 }
 0x121   :  { %v1206_v23 = vpop.eup %1205 }
 0x122   :  { %v1208_v24 = vpop.eup %1207  ;;  %1079 = vmatprep.mubr.msk.f32.mxu1 %vm510_vm3, %v1206_v23 }
 0x123   :  { %1080 = vmatmul.mubr.msk.f32.gmra.mrb[14].mxu1 %vm510_vm3, %v1208_v24 }
 0x124   :  { %1114 = vmatprep.mubr.msk.f32.mxu1 %vm1266_vm4, %v1267_v26 }
 0x1da   :  { %v1060_v28 = vpop.f32.mrb[0].mxu1 }
 0x1db   :  { %v631_v29 = vadd.f32 %v1060_v28, %v1506_v27  ;;  %v625_v30 = vpop.f32.mrb[1].mxu1 }
 0x1dc   :  { %v626_v31 = vadd.f32 %v1506_v27, %v625_v30 }
 0x1dd   :  { %1209 = vtanh.f32 %v631_v29 }
 0x1de   :  { %1211 = vtanh.f32 %v626_v31  ;;  %v1063_v32 = vpop.f32.mrb[2].mxu1 }
 0x1df   :  { %v641_v33 = vadd.f32 %v1063_v32, %v1506_v27  ;;  %v635_v34 = vpop.f32.mrb[3].mxu1 }
 0x1e0   :  { %v636_v35 = vadd.f32 %v1506_v27, %v635_v34 }
 0x1e1   :  { %1213 = vtanh.f32 %v641_v33 }
 0x1e2   :  { %1215 = vtanh.f32 %v636_v35  ;;  %v1066_v36 = vpop.f32.mrb[4].mxu1 }
 0x1e3   :  { %v651_v37 = vadd.f32 %v1066_v36, %v1506_v27  ;;  %v645_v38 = vpop.f32.mrb[5].mxu1 }
 0x1e4   :  { %v646_v39 = vadd.f32 %v1506_v27, %v645_v38 }
 0x1e5   :  { %1217 = vtanh.f32 %v651_v37 }
 0x1e6   :  { %1219 = vtanh.f32 %v646_v39  ;;  %v1069_v40 = vpop.f32.mrb[6].mxu1 }
 0x1e7   :  { %v1210_v41 = vpop.eup %1209  ;;  %v661_v42 = vadd.f32 %v1069_v40, %v1506_v27  ;;  %v655_v43 = vpop.f32.mrb[7].mxu1 }
 0x1e8   :  { %v1212_v44 = vpop.eup %1211  ;;  %v656_v45 = vadd.f32 %v1506_v27, %v655_v43 }
 0x1e9   :  { %1221 = vtanh.f32 %v661_v42  ;;  %v1126_v47 = vpack.c.bf16 %v1210_v41, %v1212_v44 }
 0x1ea   :  { %1223 = vtanh.f32 %v656_v45  ;;  %v1072_v48 = vpop.f32.mrb[8].mxu1 }
 0x1eb   :  { %v1214_v49 = vpop.eup %1213  ;;  %v671_v50 = vadd.f32 %v1072_v48, %v1506_v27  ;;  %v665_v51 = vpop.f32.mrb[9].mxu1  ;;  %1128 = vmatpush3.bf16.xpose.msk.msra.mxu1 %vm1518_vm5, %v1126_v47 }
 0x1ec   :  { %v1216_v52 = vpop.eup %1215  ;;  %v666_v53 = vadd.f32 %v1506_v27, %v665_v51  ;;  %1129 = vmatprep.subr.bf16.mxu1 %v1265_v25 }
 0x1ed   :  { %1225 = vtanh.f32 %v671_v50  ;;  %v1130_v54 = vpack.c.bf16 %v1214_v49, %v1216_v52 }
 0x1ee   :  { %1227 = vtanh.f32 %v666_v53  ;;  %v1075_v55 = vpop.f32.mrb[10].mxu1 }
 0x1ef   :  { %v1218_v56 = vpop.eup %1217  ;;  %v681_v57 = vadd.f32 %v1075_v55, %v1506_v27  ;;  %v675_v58 = vpop.f32.mrb[11].mxu1 }
 0x1f0   :  { %v1220_v59 = vpop.eup %1219  ;;  %v676_v60 = vadd.f32 %v1506_v27, %v675_v58 }
 0x1f1   :  { %1229 = vtanh.f32 %v681_v57  ;;  %v1134_v61 = vpack.c.bf16 %v1218_v56, %v1220_v59 }
 0x1f2   :  { %1231 = vtanh.f32 %v676_v60  ;;  %v1078_v62 = vpop.f32.mrb[12].mxu1 }
 0x1f3   :  { %v1222_v63 = vpop.eup %1221  ;;  %v691_v0 = vadd.f32 %v1078_v62, %v1506_v27  ;;  %v685_v1 = vpop.f32.mrb[13].mxu1  ;;  %1132 = vmatpush3.bf16.xpose.msk.msra.mxu1 %vm1518_vm5, %v1130_v54 }
 0x1f4   :  { %v1224_v2 = vpop.eup %1223  ;;  %v686_v3 = vadd.f32 %v1506_v27, %v685_v1  ;;  %1133 = vmatprep.subr.bf16.mxu1 %v1265_v25 }
 0x1f5   :  { %1233 = vtanh.f32 %v691_v0  ;;  %v1138_v4 = vpack.c.bf16 %v1222_v63, %v1224_v2 }
 0x1f6   :  { %1235 = vtanh.f32 %v686_v3  ;;  %v1081_v5 = vpop.f32.mrb[14].mxu1 }
 0x1f7   :  { %v1226_v6 = vpop.eup %1225  ;;  %v701_v7 = vadd.f32 %v1081_v5, %v1506_v27  ;;  %v695_v8 = vpop.f32.mrb[15].mxu1 }
 0x1f8   :  { %v1228_v9 = vpop.eup %1227  ;;  %v696_v10 = vadd.f32 %v1506_v27, %v695_v8 }
 0x1f9   :  { %1237 = vtanh.f32 %v701_v7  ;;  %v1142_v11 = vpack.c.bf16 %v1226_v6, %v1228_v9 }
 0x1fa   :  { %1239 = vtanh.f32 %v696_v10 }
 0x1fb   :  { %v1230_v12 = vpop.eup %1229  ;;  %1136 = vmatpush3.bf16.xpose.msk.msra.mxu1 %vm1518_vm5, %v1134_v61 }
 0x1fc   :  { %v1232_v13 = vpop.eup %1231  ;;  %1137 = vmatprep.subr.bf16.mxu1 %v1265_v25 }
 0x1fd   :  { %v1146_v14 = vpack.c.bf16 %v1230_v12, %v1232_v13 }
 0x1ff   :  { %v1234_v15 = vpop.eup %1233 }
 0x200   :  { %v1236_v16 = vpop.eup %1235 }
 0x201   :  { %v1150_v17 = vpack.c.bf16 %v1234_v15, %v1236_v16 }
 0x203   :  { %v1238_v18 = vpop.eup %1237  ;;  %1140 = vmatpush3.bf16.xpose.msk.msra.mxu1 %vm1518_vm5, %v1138_v4 }
 0x204   :  { %v1240_v19 = vpop.eup %1239  ;;  %1141 = vmatprep.subr.bf16.mxu1 %v1265_v25 }
 0x205   :  { %v1154_v20 = vpack.c.bf16 %v1238_v18, %v1240_v19 }
 0x20b   :  { %1144 = vmatpush3.bf16.xpose.msk.msra.mxu1 %vm1518_vm5, %v1142_v11 }
 0x20c   :  { %1145 = vmatprep.subr.bf16.mxu1 %v1265_v25 }
 0x213   :  { %1148 = vmatpush3.bf16.xpose.msk.msra.mxu1 %vm1518_vm5, %v1146_v14 }
 0x214   :  { %1149 = vmatprep.subr.bf16.mxu1 %v1265_v25 }
 0x21b   :  { %1152 = vmatpush3.bf16.xpose.msk.msra.mxu1 %vm1518_vm5, %v1150_v17 }
 0x21c   :  { %1153 = vmatprep.subr.bf16.mxu1 %v1265_v25 }
 0x223   :  { %1156 = vmatpush3.bf16.xpose.msk.msra.mxu1 %vm1518_vm5, %v1154_v20 }
 0x22a   :  { %1115 = vmatmul.mubr.msk.f32.vlgmr.msra.gmra.mrb[16].mxu1 %vm510_vm3, %v720_v21 }
 0x2fd   :  { %v840_v23 = vpop.f32.mrb[16].mxu1 }
 0x2fe   :  { %v841_v24 = vadd.f32 %v840_v23, %v722_v22  ;;  %v1116_v26 = vpop.f32.mrb[17].mxu1 }
 0x300   :  { %844 = vst [vmem:[#allocation3] sm:$0x1] %v841_v24 }
 0x301   :  { %1252 = shalt.err (!%p1249_p4)
}
 0x302   :  { %s1253_s2 = scalar_lea.hbm %s1581_s9, 16 }
 0x303   :  { %p1254_p5 = scmp.ne.s32.totalorder %s1581_s9, %s1253_s2  ;;  %p1257_p6 = scmp.lt.u32.totalorder %s1253_s2, %s1581_s9 }
 0x305   :  { %p1259_p7 = pnand %p1257_p6, %p1254_p5 }
 0x307   :  { %1262 = shalt.err (!%p1259_p7)
}
 0x308   :  { %854 = dma.vmem_to_hbm [thread:$0]  %s852_s3, 16, %s1581_s9, [#allocation4]  }
 0x309   :  { %1263 = dma.done.wait [#allocation4], 16  }
 0x30a   :  { %1264 = vsyncadd [#allocation4], 4294967280 }
 0x30b   :  { %858 = vsyncpa [#allocation4], 1 }

</bundles_post_ra>
